<compile_context>
chip_gen: v7x
topology: tpu7x:2x2x1
jax: 0.10.0
libtpu: 0.0.40
codegen_flags: <defaults>
</compile_context>

<pallas_src>
import jax
import jax.numpy as jnp
from jax.experimental import pallas as pl
from jax.experimental.pallas import tpu as pltpu


def time_embedding_kernel(x_ref, w1_ref, b1_ref, w2_ref, b2_ref, o_ref, acc_ref):
    k = pl.program_id(1)

    @pl.when(k == 0)
    def _():
        acc_ref[...] = jnp.zeros_like(acc_ref)

    # Linear 1 (column slice of W1): h[:, k-tile] = silu(x @ W1[:, k-tile] + b1[k-tile]).
    # bf16 MXU inputs, fp32 accumulation; bias add + SiLU (EUP sigmoid) in fp32.
    h = jnp.dot(x_ref[...], w1_ref[...], preferred_element_type=jnp.float32)
    h = h + b1_ref[...]
    h = h * jax.nn.sigmoid(h)

    # Linear 2 (partial product): accumulate (B, tk) @ W2[k-tile, n-tile] in fp32 scratch.
    acc_ref[...] += jnp.dot(h.astype(w2_ref.dtype), w2_ref[...],
                            preferred_element_type=jnp.float32)

    @pl.when(k == pl.num_programs(1) - 1)
    def _():
        o_ref[...] = (acc_ref[...] + b2_ref[...]).astype(o_ref.dtype)


def time_embedding(x, w1, b1, w2, b2, *, tn=None, tk=None):
    """x: (B, E); w1: (E, 4E); b1: (4E,); w2: (4E, 4E); b2: (4E,).

    Weights are (in_features, out_features), i.e. PyTorch nn.Linear.weight.T.
    """
    B, E = x.shape
    H = w1.shape[1]
    assert w1.shape == (E, H) and w2.shape == (H, H)
    assert b1.shape == (H,) and b2.shape == (H,)

    # Tile sizes: full H when small; capped so the streamed W1/W2 tiles fit
    # comfortably in VMEM with double buffering on every chip generation.
    tn = tn if tn is not None else min(H, 512)
    tk = tk if tk is not None else min(H, 512)
    assert H % tn == 0 and H % tk == 0

    # bf16 weights / activations for the MXU; biases and accumulation stay fp32.
    x_bf16 = x.astype(jnp.bfloat16)
    w1_bf16 = w1.astype(jnp.bfloat16)
    w2_bf16 = w2.astype(jnp.bfloat16)
    b1_2d = b1.reshape(1, H).astype(jnp.float32)
    b2_2d = b2.reshape(1, H).astype(jnp.float32)

    grid = (H // tn, H // tk)  # (N output tiles [parallel], K reduction tiles [last])

    return pl.pallas_call(
        time_embedding_kernel,
        out_shape=jax.ShapeDtypeStruct((B, H), x.dtype),
        grid_spec=pltpu.PrefetchScalarGridSpec(
            num_scalar_prefetch=0,
            grid=grid,
            in_specs=[
                pl.BlockSpec((B, E), lambda j, k: (0, 0)),    # x (resident)
                pl.BlockSpec((E, tk), lambda j, k: (0, k)),   # W1 column tile
                pl.BlockSpec((1, tk), lambda j, k: (0, k)),   # b1 tile
                pl.BlockSpec((tk, tn), lambda j, k: (k, j)),  # W2 tile
                pl.BlockSpec((1, tn), lambda j, k: (0, j)),   # b2 tile
            ],
            out_specs=pl.BlockSpec((B, tn), lambda j, k: (0, j)),
            scratch_shapes=[pltpu.VMEM((B, tn), jnp.float32)],
        ),
        compiler_params=pltpu.CompilerParams(
            dimension_semantics=("parallel", "arbitrary")),
    )(x_bf16, w1_bf16, b1_2d, w2_bf16, b2_2d)


def _reference(x, w1, b1, w2, b2):
    h = x @ w1 + b1
    h = h * jax.nn.sigmoid(h)
    return h @ w2 + b2


if __name__ == "__main__":
    embedding_size = 32            # E
    batch = 2                      # B
    hidden = 4 * embedding_size    # 4E = 128

    key = jax.random.PRNGKey(0)
    kx, k1, k2, k3, k4 = jax.random.split(key, 5)

    # Deterministic parameter init (PyTorch-Linear-like uniform bounds).
    bound1 = 1.0 / (embedding_size ** 0.5)
    bound2 = 1.0 / (hidden ** 0.5)
    x = jax.random.normal(kx, (batch, embedding_size), dtype=jnp.float32)
    w1 = jax.random.uniform(k1, (embedding_size, hidden), jnp.float32,
                            -bound1, bound1)
    b1 = jax.random.uniform(k2, (hidden,), jnp.float32, -bound1, bound1)
    w2 = jax.random.uniform(k3, (hidden, hidden), jnp.float32,
                            -bound2, bound2)
    b2 = jax.random.uniform(k4, (hidden,), jnp.float32, -bound2, bound2)

    out = time_embedding(x, w1, b1, w2, b2)
    out = jax.block_until_ready(out)

    ref = _reference(x, w1, b1, w2, b2)
    assert out.shape == (batch, hidden)
    # bf16 weights / activations on the MXU -> loosen the fp32 tolerance.
    assert jnp.allclose(out, ref, atol=1e-2, rtol=1e-2), "mismatch vs reference"

    print("KERNEL_OK")
</pallas_src>

<mosaic_0001>
module attributes {stable_mosaic.version = 11 : i64} {
  func.func @time_embedding_kernel(%arg0: i32, %arg1: i32, %arg2: memref<2x32xbf16, #tpu.memory_space<vmem>>, %arg3: memref<32x128xbf16, #tpu.memory_space<vmem>>, %arg4: memref<1x128xf32, #tpu.memory_space<vmem>>, %arg5: memref<128x128xbf16, #tpu.memory_space<vmem>>, %arg6: memref<1x128xf32, #tpu.memory_space<vmem>>, %arg7: memref<2x128xf32, #tpu.memory_space<vmem>>, %arg8: memref<2x128xf32, #tpu.memory_space<vmem>>) attributes {dimension_semantics = [#tpu.dimension_semantics<parallel>, #tpu.dimension_semantics<arbitrary>], iteration_bounds = array<i64: 1, 1>, scalar_prefetch = 0 : i64, scratch_operands = 1 : i64, tpu.core_type = #tpu.core_type<tc>, window_params = [{pipeline_mode = #tpu.pipeline_mode<synchronous>, transform_indices = @transform_0, window_bounds = array<i64: 2, 32>}, {transform_indices = @transform_1, window_bounds = array<i64: 32, 128>}, {transform_indices = @transform_2, window_bounds = array<i64: 1, 128>}, {transform_indices = @transform_3, window_bounds = array<i64: 128, 128>}, {transform_indices = @transform_4, window_bounds = array<i64: 1, 128>}, {transform_indices = @transform_5, window_bounds = array<i64: 2, 128>}]} {
    %c0_i32 = arith.constant 0 : i32
    %0 = arith.cmpi eq, %arg1, %c0_i32 : i32
    %1 = arith.extui %0 : i1 to i32
    %c0_i32_0 = arith.constant 0 : i32
    %2 = arith.cmpi ne, %1, %c0_i32_0 : i32
    scf.if %2 {
      %cst_16 = arith.constant 0.000000e+00 : f32
      %24 = vector.broadcast %cst_16 : f32 to vector<2x128xf32>
      %c0_17 = arith.constant 0 : index
      %c0_18 = arith.constant 0 : index
      %25 = vector.load %arg8[%c0_17, %c0_18] : memref<2x128xf32, #tpu.memory_space<vmem>>, vector<2x128xf32>
      tpu.vector_store %arg8[%c0_17, %c0_18], %24 {strides = array<i32>} : memref<2x128xf32, #tpu.memory_space<vmem>>, vector<2x128xf32>,
    } else {
    }
    %c0 = arith.constant 0 : index
    %c0_1 = arith.constant 0 : index
    %3 = vector.load %arg2[%c0, %c0_1] : memref<2x32xbf16, #tpu.memory_space<vmem>>, vector<2x32xbf16>
    %c0_2 = arith.constant 0 : index
    %c0_3 = arith.constant 0 : index
    %4 = vector.load %arg3[%c0_2, %c0_3] : memref<32x128xbf16, #tpu.memory_space<vmem>>, vector<32x128xbf16>
    %cst = arith.constant dense<0.000000e+00> : vector<2x128xf32>
    %5 = tpu.matmul %3, %4, %cst {dimension_numbers = #tpu.dot_dimension_numbers<[1], [0], [0], [1], [0, 0, 1, 1], [], []>} : vector<2x32xbf16>, vector<32x128xbf16>, vector<2x128xf32> -> vector<2x128xf32>
    %c0_4 = arith.constant 0 : index
    %c0_5 = arith.constant 0 : index
    %6 = vector.load %arg4[%c0_4, %c0_5] : memref<1x128xf32, #tpu.memory_space<vmem>>, vector<1x128xf32>
    %7 = vector.broadcast %6 : vector<1x128xf32> to vector<2x128xf32>
    %8 = arith.addf %5, %7 : vector<2x128xf32>
    %9 = arith.negf %8 : vector<2x128xf32>
    %10 = math.exp %9 : vector<2x128xf32>
    %cst_6 = arith.constant 1.000000e+00 : f32
    %11 = vector.broadcast %cst_6 : f32 to vector<2x128xf32>
    %12 = arith.addf %11, %10 : vector<2x128xf32>
    %13 = arith.divf %11, %12 : vector<2x128xf32>
    %14 = arith.mulf %8, %13 : vector<2x128xf32>
    %c0_7 = arith.constant 0 : index
    %c0_8 = arith.constant 0 : index
    %15 = vector.load %arg8[%c0_7, %c0_8] : memref<2x128xf32, #tpu.memory_space<vmem>>, vector<2x128xf32>
    %16 = arith.truncf %14 : vector<2x128xf32> to vector<2x128xbf16>
    %c0_9 = arith.constant 0 : index
    %c0_10 = arith.constant 0 : index
    %17 = vector.load %arg5[%c0_9, %c0_10] : memref<128x128xbf16, #tpu.memory_space<vmem>>, vector<128x128xbf16>
    %cst_11 = arith.constant dense<0.000000e+00> : vector<2x128xf32>
    %18 = tpu.matmul %16, %17, %cst_11 {dimension_numbers = #tpu.dot_dimension_numbers<[1], [0], [0], [1], [0, 0, 1, 1], [], []>} : vector<2x128xbf16>, vector<128x128xbf16>, vector<2x128xf32> -> vector<2x128xf32>
    %19 = arith.addf %15, %18 : vector<2x128xf32>
    %c0_12 = arith.constant 0 : index
    %c0_13 = arith.constant 0 : index
    %20 = vector.load %arg8[%c0_12, %c0_13] : memref<2x128xf32, #tpu.memory_space<vmem>>, vector<2x128xf32>
    tpu.vector_store %arg8[%c0_12, %c0_13], %19 {strides = array<i32>} : memref<2x128xf32, #tpu.memory_space<vmem>>, vector<2x128xf32>,
    %c0_i32_14 = arith.constant 0 : i32
    %21 = arith.cmpi eq, %arg1, %c0_i32_14 : i32
    %22 = arith.extui %21 : i1 to i32
    %c0_i32_15 = arith.constant 0 : i32
    %23 = arith.cmpi ne, %22, %c0_i32_15 : i32
    scf.if %23 {
      %c0_16 = arith.constant 0 : index
      %c0_17 = arith.constant 0 : index
      %24 = vector.load %arg8[%c0_16, %c0_17] : memref<2x128xf32, #tpu.memory_space<vmem>>, vector<2x128xf32>
      %c0_18 = arith.constant 0 : index
      %c0_19 = arith.constant 0 : index
      %25 = vector.load %arg6[%c0_18, %c0_19] : memref<1x128xf32, #tpu.memory_space<vmem>>, vector<1x128xf32>
      %26 = vector.broadcast %25 : vector<1x128xf32> to vector<2x128xf32>
      %27 = arith.addf %24, %26 : vector<2x128xf32>
      %c0_20 = arith.constant 0 : index
      %c0_21 = arith.constant 0 : index
      %28 = vector.load %arg7[%c0_20, %c0_21] : memref<2x128xf32, #tpu.memory_space<vmem>>, vector<2x128xf32>
      tpu.vector_store %arg7[%c0_20, %c0_21], %27 {strides = array<i32>} : memref<2x128xf32, #tpu.memory_space<vmem>>, vector<2x128xf32>,
    } else {
    }
    return
  }
  func.func @transform_0(%arg0: i32, %arg1: i32) -> (i32, i32) {
    %c0_i32 = arith.constant 0 : i32
    %c0_i32_0 = arith.constant 0 : i32
    %c0_i32_1 = arith.constant 0 : i32
    return %c0_i32, %c0_i32_0 : i32, i32
  }
  func.func @transform_1(%arg0: i32, %arg1: i32) -> (i32, i32) {
    %c0_i32 = arith.constant 0 : i32
    %c0_i32_0 = arith.constant 0 : i32
    return %c0_i32, %arg1 : i32, i32
  }
  func.func @transform_2(%arg0: i32, %arg1: i32) -> (i32, i32) {
    %c0_i32 = arith.constant 0 : i32
    %c0_i32_0 = arith.constant 0 : i32
    return %c0_i32, %arg1 : i32, i32
  }
  func.func @transform_3(%arg0: i32, %arg1: i32) -> (i32, i32) {
    %c0_i32 = arith.constant 0 : i32
    return %arg1, %arg0 : i32, i32
  }
  func.func @transform_4(%arg0: i32, %arg1: i32) -> (i32, i32) {
    %c0_i32 = arith.constant 0 : i32
    %c0_i32_0 = arith.constant 0 : i32
    return %c0_i32, %arg0 : i32, i32
  }
  func.func @transform_5(%arg0: i32, %arg1: i32) -> (i32, i32) {
    %c0_i32 = arith.constant 0 : i32
    %c0_i32_0 = arith.constant 0 : i32
    return %c0_i32, %arg0 : i32, i32
  }
}

</mosaic_0001>

<bundles_post_ra>
// kernel: tpu_custom_call.1
= control target key start
LH: loop header
LB: loop body
LE: loop exit
PB: predicated region body
PF: predicated region fallthrough
CT: control target
= control target key end

     0   :  { %10 = vsyncpa [#allocation4], 0  ;;  %s546_s0 = inlined_call_operand.hbm [shape: bf16[2,32], index: 0, kind: input, shape index: {}]   ;;  %s547_s1 = inlined_call_operand.hbm [shape: bf16[32,128], index: 1, kind: input, shape index: {}]   ;;  %s548_s2 = inlined_call_operand.vmem [shape: f32[1,128], index: 2, kind: input, shape index: {}]   ;;  %s549_s3 = inlined_call_operand.hbm [shape: bf16[128,128], index: 3, kind: input, shape index: {}]   ;;  %s550_s4 = inlined_call_operand.vmem [shape: f32[1,128], index: 4, kind: input, shape index: {}]   ;;  %s551_s5 = inlined_call_operand.hbm [shape: f32[2,128], index: 5, kind: output, shape index: {}]  }
   0x1   :  { %11 = vsyncpa [#allocation7], 0 }
   0x2   :  { %12 = vsyncpa [#allocation5], 0  ;;  %s448_s18 = smov [#allocation6]   ;;  %s354_s22 = scalar_lea.hbm %s547_s1, 256 }
   0x3   :  { %s28_s19 = sshll.u32 %s448_s18, 4  ;;  %p355_p0 = scmp.ne.s32.totalorder %s547_s1, %s354_s22  ;;  %s29_s19 = int_to_ptr.vmem [resolvable:$true] %s28_s19 }
   0x4   :  { %p358_p1 = scmp.lt.u32.totalorder %s354_s22, %s547_s1 }
   0x6   :  { %p360_p2 = pnand %p358_p1, %p355_p0 }
   0x8   :  { %363 = shalt.err (!%p360_p2)
}
   0x9   :  { %s364_s27 = scalar_lea.vmem %s29_s19, 256  ;;  %p369_p4 = scmp.lt.s32.totalorder %s29_s19, %s29_s19 }
   0xa   :  { %p365_p3 = scmp.ne.s32.totalorder %s29_s19, %s364_s27  ;;  %p370_p5 = scmp.lt.s32.totalorder %s364_s27, %s364_s27 }
   0xc   :  { %p371_p6 = por %p370_p5, %p369_p4 }
   0xe   :  { %p372_p7 = pnand %p371_p6, %p365_p3 }
  0x10   :  { %375 = shalt.err (!%p372_p7)
}
  0x11   :  { %s449_s28 = smov 64   ;;  %s450_s29 = smov 4  }
  0x12   :  { %34 = dma.hbm_to_vmem [thread:$0]  %s547_s1, 256, %s29_s19, [#allocation7], %s449_s28, %s449_s28, %s450_s29  }
  0x13   :  { %s451_s7 = smov [#allocation3]   ;;  %s452_s9 = smov [#allocation8]  }
  0x14   :  { %s19_s8 = sshll.u32 %s451_s7, 4  ;;  %s42_s10 = sshll.u32 %s452_s9, 4  ;;  %s20_s8 = int_to_ptr.vmem [resolvable:$true] %s19_s8  ;;  %s43_s10 = int_to_ptr.vmem [resolvable:$true] %s42_s10 }
  0x15   :  { %s376_s13 = scalar_lea.hbm %s546_s0, 16 }
  0x16   :  { %p377_p8 = scmp.ne.s32.totalorder %s546_s0, %s376_s13  ;;  %p380_p9 = scmp.lt.u32.totalorder %s376_s13, %s546_s0 }
  0x18   :  { %p382_p10 = pnand %p380_p9, %p377_p8 }
  0x1a   :  { %385 = shalt.err (!%p382_p10)
}
  0x1b   :  { %s386_s1 = scalar_lea.vmem %s20_s8, 16  ;;  %s390_s18 = scalar_lea.vmem %s20_s8, 32 }
  0x1c   :  { %p387_p11 = scmp.ne.s32.totalorder %s20_s8, %s386_s1  ;;  %p391_p12 = scmp.lt.s32.totalorder %s20_s8, %s20_s8 }
  0x1d   :  { %p392_p13 = scmp.lt.s32.totalorder %s390_s18, %s386_s1 }
  0x1f   :  { %p393_p0 = por %p392_p13, %p391_p12 }
  0x21   :  { %p394_p1 = pnand %p393_p0, %p387_p11 }
  0x23   :  { %397 = shalt.err (!%p394_p1)
}
  0x24   :  { %22 = dma.hbm_to_vmem [thread:$0]  %s546_s0, 16, %s20_s8, [#allocation4]  }
  0x25   :  { %s398_s23 = scalar_lea.hbm %s549_s3, 1024 }
  0x26   :  { %p399_p2 = scmp.ne.s32.totalorder %s549_s3, %s398_s23  ;;  %p402_p3 = scmp.lt.u32.totalorder %s398_s23, %s549_s3 }
  0x28   :  { %p404_p4 = pnand %p402_p3, %p399_p2 }
  0x2a   :  { %407 = shalt.err (!%p404_p4)
}
  0x2b   :  { %s408_s30 = scalar_lea.vmem %s43_s10, 1024  ;;  %p413_p6 = scmp.lt.s32.totalorder %s43_s10, %s43_s10 }
  0x2c   :  { %p409_p5 = scmp.ne.s32.totalorder %s43_s10, %s408_s30  ;;  %p414_p7 = scmp.lt.s32.totalorder %s408_s30, %s408_s30 }
  0x2e   :  { %p415_p8 = por %p414_p7, %p413_p6 }
  0x30   :  { %p416_p9 = pnand %p415_p8, %p409_p5 }
  0x32   :  { %419 = shalt.err (!%p416_p9)
}
  0x33   :  { %48 = dma.hbm_to_vmem [thread:$0]  %s549_s3, 1024, %s43_s10, [#allocation7], %s449_s28, %s449_s28, %s450_s29  }
  0x34   :  { %442 = dma.done.wait [#allocation4], 16  }
  0x35   :  { %443 = vsyncadd [#allocation4], 4294967280 }
  0x36   :  { %444 = dma.done.wait [#allocation7], 1280  }
  0x37   :  { %445 = vsyncadd [#allocation7], 4294966016  ;;  %v453_v0 = vmov 0.0   ;;  %vm454_vm0 = vmmov 0   ;;  %v340_v1 = vld [vmem:[#allocation6] sm:$0xff]   ;;  %v341_v2 = vld [vmem:[#allocation6 + $0x8] sm:$0xff]  }
  0x38   :  { %304 = vmatprep.subr.bf16.mxu0 %v453_v0  ;;  %65 = vst [vmem:[#allocation2] sm:$0x3] %v453_v0  ;;  %308 = vmatprep.mubr.msk.bf16.mxu0 %vm454_vm0, %v453_v0  ;;  %vm90_vm1 = vcmask 261120   ;;  %v66_v3 = vld [vmem:[#allocation3] sm:$0x1]  ;;  %v342_v4 = vld [vmem:[#allocation8] sm:$0xff]  }
  0x39   :  { %312 = vmatprep.subr.bf16.mxu1 %v453_v0  ;;  %328 = vmatprep.mubr.msk.bf16.mxu1 %vm454_vm0, %v453_v0  ;;  %v343_v5 = vld [vmem:[#allocation8 + $0x8] sm:$0xff]   ;;  %v344_v6 = vld [vmem:[#allocation8 + $0x10] sm:$0xff]   ;;  %v345_v7 = vld [vmem:[#allocation8 + $0x18] sm:$0xff]   ;;  %s455_s7 = smov [#allocation9]  }
  0x3a   :  { %305 = vmatpush3.bf16.msra.mxu0 %v340_v1  ;;  %313 = vmatpush3.bf16.msra.mxu1 %v342_v4  ;;  %v346_v8 = vld [vmem:[#allocation8 + $0x20] sm:$0xff]   ;;  %v347_v9 = vld [vmem:[#allocation8 + $0x28] sm:$0xff]   ;;  %v348_v10 = vld [vmem:[#allocation8 + $0x30] sm:$0xff]   ;;  %s268_s8 = sshll.u32 %s455_s7, 4  ;;  %s269_s8 = int_to_ptr.vmem [resolvable:$true] %s268_s8 }
  0x3b   :  { %306 = vmatprep.subr.bf16.mxu0 %v453_v0  ;;  %314 = vmatprep.subr.bf16.mxu1 %v453_v0  ;;  %v349_v11 = vld [vmem:[#allocation8 + $0x38] sm:$0xff]   ;;  %v278_v12 = vld [vmem:[%s548_s2] ss:$0 sm:$0xff]  ;;  %s420_s9 = scalar_lea.vmem %s269_s8, 32  ;;  %p425_p11 = scmp.lt.s32.totalorder %s269_s8, %s269_s8 }
  0x3c   :  { %v291_v30 = vld [vmem:[%s550_s4] ss:$0 sm:$0xff]  ;;  %p421_p10 = scmp.ne.s32.totalorder %s269_s8, %s420_s9  ;;  %p426_p12 = scmp.lt.s32.totalorder %s420_s9, %s420_s9 }
  0x3e   :  { %307 = vmatpush3.bf16.msra.mxu0 %v341_v2  ;;  %315 = vmatpush3.bf16.msra.mxu1 %v343_v5  ;;  %p427_p13 = por %p426_p12, %p425_p11 }
  0x3f   :  { %316 = vmatprep.subr.bf16.mxu1 %v453_v0  ;;  %v141_v24 = vld [vmem:[#allocation2] sm:$0x3] }
  0x40   :  { %p428_p0 = pnand %p427_p13, %p421_p10 }
  0x41   :  { %309 = vmatmul.mubr.msk.bf16.vlgmr.msra.gmra.mrb[0].mxu0 %vm90_vm1, %v66_v3 }
  0x42   :  { %317 = vmatpush3.bf16.msra.mxu1 %v344_v6 }
  0x43   :  { %318 = vmatprep.subr.bf16.mxu1 %v453_v0 }
  0x46   :  { %319 = vmatpush3.bf16.msra.mxu1 %v345_v7 }
  0x47   :  { %320 = vmatprep.subr.bf16.mxu1 %v453_v0 }
  0x4a   :  { %321 = vmatpush3.bf16.msra.mxu1 %v346_v8 }
  0x4b   :  { %322 = vmatprep.subr.bf16.mxu1 %v453_v0 }
  0x4e   :  { %323 = vmatpush3.bf16.msra.mxu1 %v347_v9 }
  0x4f   :  { %324 = vmatprep.subr.bf16.mxu1 %v453_v0 }
  0x52   :  { %325 = vmatpush3.bf16.msra.mxu1 %v348_v10 }
  0x53   :  { %326 = vmatprep.subr.bf16.mxu1 %v453_v0 }
  0x56   :  { %327 = vmatpush3.bf16.msra.mxu1 %v349_v11 }
 0x114   :  { %v128_v13 = vpop.f32.mrb[0].mxu0 }
 0x115   :  { %v129_v14 = vadd.f32 %v278_v12, %v128_v13  ;;  %v310_v15 = vpop.f32.mrb[1].mxu0 }
 0x116   :  { %v131_v16 = vpop.f32.mrb[2].mxu0 }
 0x117   :  { %v282_v17 = vmul.f32 -1.442695, %v129_v14  ;;  %v311_v18 = vpop.f32.mrb[3].mxu0 }
 0x119   :  { %350 = vpow2.f32 %v282_v17 }
 0x123   :  { %v351_v19 = vpop.eup %350 }
 0x124   :  { %v137_v20 = vadd.f32 1.0, %v351_v19 }
 0x126   :  { %352 = vrcp.f32 %v137_v20 }
 0x130   :  { %v353_v21 = vpop.eup %352 }
 0x131   :  { %v140_v22 = vmul.f32 %v353_v21, %v129_v14 }
 0x133   :  { %v142_v23 = vpack.c.bf16 %v140_v22, %v140_v22 }
 0x135   :  { %329 = vmatmul.mubr.bf16.vlgmr.msra.gmra.mrb[0].mxu1 %v142_v23 }
 0x208   :  { %v241_v25 = vpop.f32.mrb[0].mxu1 }
 0x209   :  { %v247_v26 = vadd.f32 %v241_v25, %v141_v24  ;;  %v330_v27 = vpop.f32.mrb[1].mxu1 }
 0x20a   :  { %v244_v28 = vpop.f32.mrb[2].mxu1 }
 0x20b   :  { %248 = vst [vmem:[#allocation2] sm:$0x3] %v247_v26  ;;  %v331_v29 = vpop.f32.mrb[3].mxu1 }
 0x212   :  { %v252_v31 = vld [vmem:[#allocation2] sm:$0x3] }
 0x213   :  { %v260_v32 = vadd.f32 %v291_v30, %v252_v31 }
 0x215   :  { %261 = vst [vmem:[#allocation9] sm:$0x3] %v260_v32 }
 0x216   :  { %431 = shalt.err (!%p428_p0)
}
 0x217   :  { %s432_s12 = scalar_lea.hbm %s551_s5, 32 }
 0x218   :  { %p433_p1 = scmp.ne.s32.totalorder %s551_s5, %s432_s12  ;;  %p436_p2 = scmp.lt.u32.totalorder %s432_s12, %s551_s5 }
 0x21a   :  { %p438_p3 = pnand %p436_p2, %p433_p1 }
 0x21c   :  { %441 = shalt.err (!%p438_p3)
}
 0x21d   :  { %271 = dma.vmem_to_hbm [thread:$0]  %s269_s8, 32, %s551_s5, [#allocation5]  }
 0x21e   :  { %446 = dma.done.wait [#allocation5], 32  }
 0x21f   :  { %447 = vsyncadd [#allocation5], 4294967264 }
 0x220   :  { %275 = vsyncpa [#allocation4], 1 }
 0x221   :  { %276 = vsyncpa [#allocation7], 1 }
 0x222   :  { %277 = vsyncpa [#allocation5], 1 }

</bundles_post_ra>
